<compile_context>
chip_gen: v7x
topology: tpu7x:2x2x1
jax: 0.10.0
libtpu: 0.0.40
codegen_flags: <defaults>
</compile_context>

<pallas_src>
import functools

import jax
import jax.numpy as jnp
from jax import lax
from jax.experimental import pallas as pl
from jax.experimental.pallas import tpu as pltpu

Q_MIN = 0      # torch.iinfo(torch.quint8).min
Q_MAX = 255    # torch.iinfo(torch.quint8).max
_EPS = 1e-12   # guard for degenerate (constant) inputs where scale would be 0

# ~8 MiB of f32 per row block (2M elements).  Double-buffered pass-2 footprint is
# ~2.5x block bytes ~= 20 MiB; we request a 40 MiB scoped-VMEM limit, which is safe
# on every generation (v5e/v6e 128 MiB physical, v7x 64 MiB physical per TC).
_BLOCK_ELEMS = 1 << 21
_VMEM_LIMIT_BYTES = 40 * 1024 * 1024


def _choose_layout(total):
    """Pick a lane-dense (M, L) layout and a bounded row-block size tm."""
    assert total % 128 == 0, "flattened element count must be a multiple of 128"
    assert total >= 8 * 128, "demo assumes at least one (8, 128) f32 tile"
    lane = 128
    for cand in (1024, 512, 256, 128):
        if total % cand == 0 and total // cand >= 8:
            lane = cand
            break
    m = total // lane
    tm = min(m, max(32, _BLOCK_ELEMS // lane))
    if tm < m:
        # 32-row alignment covers f32 (8,128), bf16 (16,128) and uint8 (32,128) tiling.
        tm -= tm % 32
    return m, lane, tm


# ---------------- Pass 1: per-block partial [min; max] (hot path) ----------------
def _minmax_partial_kernel(x_ref, mm_ref, *, rows, tm, need_mask):
    x = x_ref[...].astype(jnp.float32)

    def _reduce_store(x_lo, x_hi):
        mn = jnp.min(x_lo, axis=0, keepdims=True)           # (1, L)
        mx = jnp.max(x_hi, axis=0, keepdims=True)           # (1, L)
        mm_ref[...] = jnp.concatenate([mn, mx], axis=0)[None]  # (1, 2, L)

    if need_mask:
        last = pl.num_programs(0) - 1

        # Fast path: every full block skips the iota/compare/select entirely.
        @pl.when(pl.program_id(0) != last)
        def _():
            _reduce_store(x, x)

        # Only the final (partial) block neutralizes its padded rows.
        @pl.when(pl.program_id(0) == last)
        def _():
            row = tm * pl.program_id(0) + lax.broadcasted_iota(jnp.int32, x.shape, 0)
            valid = row < rows
            _reduce_store(jnp.where(valid, x, jnp.inf),
                          jnp.where(valid, x, -jnp.inf))
    else:
        _reduce_store(x, x)


# ---------------- Pass 2: elementwise quantize (hot path) ----------------
def _quantize_kernel(params_ref, x_ref, q_ref):
    # params_ref lives in SMEM: [inv_scale, zero_point_f32], computed once outside.
    inv_scale = params_ref[0]
    zp = params_ref[1]
    x = x_ref[...].astype(jnp.float32)
    q = jnp.round(x * inv_scale) + zp          # multiply, not divide (no VALU/EUP recip chain)
    q_ref[...] = jnp.clip(q, jnp.float32(Q_MIN), jnp.float32(Q_MAX)).astype(jnp.uint8)
    # Note: out-of-range rows of a non-dividing final block are dropped on writeback,
    # so no mask is needed here.


@jax.jit
def qinput_forward(x):
    """Returns (q_uint8 with x's shape, scale, zero_point) — the int_repr /
    qscheme triple of the torch quantized tensor."""
    # TODO(synk): running calibration state across multiple forward calls
    # (folding previous self.d_min / self.d_max) is host-side module state and is
    # not part of this single-call kernel.
    orig_shape = x.shape
    m, lane, tm = _choose_layout(x.size)
    x2d = x.reshape(m, lane)                   # keep source dtype; cast in-kernel
    grid = pl.cdiv(m, tm)
    need_mask = (grid * tm) != m

    cparams = pltpu.CompilerParams(dimension_semantics=("parallel",),
                                   vmem_limit_bytes=_VMEM_LIMIT_BYTES)

    # ---- pass 1: per-block partial [min; max] ----
    partials = pl.pallas_call(
        functools.partial(_minmax_partial_kernel, rows=m, tm=tm, need_mask=need_mask),
        out_shape=jax.ShapeDtypeStruct((grid, 2, lane), jnp.float32),
        grid=(grid,),
        in_specs=[pl.BlockSpec((tm, lane), lambda i: (i, 0))],
        out_specs=pl.BlockSpec((1, 2, lane), lambda i: (i, 0, 0)),
        compiler_params=cparams,
    )(x2d)

    # Tiny final reduce + parameter derivation (fused by XLA under jit; negligible
    # next to the two HBM sweeps).  zero_point uses trunc-toward-zero like torch's
    # int cast of the float offset.
    d_min = jnp.min(partials[:, 0, :])
    d_max = jnp.max(partials[:, 1, :])
    scale = jnp.maximum((d_max - d_min) / jnp.float32(Q_MAX - Q_MIN), jnp.float32(_EPS))
    zp_f = jnp.clip(jnp.float32(Q_MIN) - d_min / scale,
                    jnp.float32(Q_MIN), jnp.float32(Q_MAX))
    zero_point = zp_f.astype(jnp.int32)        # truncation toward zero (torch int cast)
    inv_scale = jnp.float32(1.0) / scale
    params = jnp.stack([inv_scale, zero_point.astype(jnp.float32)])  # (2,) f32 -> SMEM

    # ---- pass 2: quantize ----
    q2d = pl.pallas_call(
        _quantize_kernel,
        out_shape=jax.ShapeDtypeStruct((m, lane), jnp.uint8),
        grid=(grid,),
        in_specs=[pl.BlockSpec(memory_space=pltpu.MemorySpace.SMEM),
                  pl.BlockSpec((tm, lane), lambda i: (i, 0))],
        out_specs=pl.BlockSpec((tm, lane), lambda i: (i, 0)),
        compiler_params=cparams,
    )(params, x2d)

    return q2d.reshape(orig_shape), scale, zero_point


def _reference(x):
    x = x.astype(jnp.float32)
    d_min = jnp.min(x)
    d_max = jnp.max(x)
    scale = jnp.maximum((d_max - d_min) / jnp.float32(Q_MAX - Q_MIN), jnp.float32(_EPS))
    zp = jnp.clip(jnp.float32(Q_MIN) - d_min / scale,
                  jnp.float32(Q_MIN), jnp.float32(Q_MAX)).astype(jnp.int32)
    q = jnp.clip(jnp.round(x / scale) + zp, Q_MIN, Q_MAX).astype(jnp.uint8)
    return q, scale, zp


if __name__ == "__main__":
    key = jax.random.PRNGKey(0)
    x = jax.random.normal(key, (2, 4, 16, 16), dtype=jnp.float32) * 3.0 + 0.5

    q, scale, zp = qinput_forward(x)
    q = jax.block_until_ready(q)
    scale = jax.block_until_ready(scale)
    zp = jax.block_until_ready(zp)

    q_ref, scale_ref, zp_ref = _reference(x)
    assert q.shape == x.shape and q.dtype == jnp.uint8
    assert jnp.allclose(scale, scale_ref, rtol=1e-6)
    assert int(zp) == int(zp_ref)
    # reciprocal-multiply vs divide (and rounding ties) may differ by at most one level
    assert int(jnp.max(jnp.abs(q.astype(jnp.int32) - q_ref.astype(jnp.int32)))) <= 1

    print("KERNEL_OK")
</pallas_src>

<mosaic_0001>
module attributes {stable_mosaic.version = 11 : i64} {
  func.func @_minmax_partial_kernel(%arg0: i32, %arg1: memref<8x256xf32, #tpu.memory_space<vmem>>, %arg2: memref<1x2x256xf32, #tpu.memory_space<vmem>>) attributes {dimension_semantics = [#tpu.dimension_semantics<parallel>], iteration_bounds = array<i64: 1>, scalar_prefetch = 0 : i64, scratch_operands = 0 : i64, tpu.core_type = #tpu.core_type<tc>, window_params = [{transform_indices = @transform_0, window_bounds = array<i64: 8, 256>}, {transform_indices = @transform_1, window_bounds = array<i64: 1, 2, 256>}]} {
    %c0 = arith.constant 0 : index
    %c0_0 = arith.constant 0 : index
    %0 = vector.load %arg1[%c0, %c0_0] : memref<8x256xf32, #tpu.memory_space<vmem>>, vector<8x256xf32>
    %cst = arith.constant dense<0x7F800000> : vector<256xf32>
    %1 = vector.multi_reduction <minimumf>, %0, %cst [0] : vector<8x256xf32> to vector<256xf32>
    %2 = vector.shape_cast %1 : vector<256xf32> to vector<1x256xf32>
    %cst_1 = arith.constant dense<0xFF800000> : vector<256xf32>
    %3 = vector.multi_reduction <maximumf>, %0, %cst_1 [0] : vector<8x256xf32> to vector<256xf32>
    %4 = vector.shape_cast %3 : vector<256xf32> to vector<1x256xf32>
    %5 = tpu.concatenate %2, %4 in 0 : vector<1x256xf32>, vector<1x256xf32> -> vector<2x256xf32>
    %6 = vector.shape_cast %5 : vector<2x256xf32> to vector<1x2x256xf32>
    %c0_2 = arith.constant 0 : index
    %c0_3 = arith.constant 0 : index
    %c0_4 = arith.constant 0 : index
    %7 = vector.load %arg2[%c0_2, %c0_3, %c0_4] : memref<1x2x256xf32, #tpu.memory_space<vmem>>, vector<1x2x256xf32>
    tpu.vector_store %arg2[%c0_2, %c0_3, %c0_4], %6 {strides = array<i32>} : memref<1x2x256xf32, #tpu.memory_space<vmem>>, vector<1x2x256xf32>,
    return
  }
  func.func @transform_0(%arg0: i32) -> (i32, i32) {
    %c0_i32 = arith.constant 0 : i32
    %c0_i32_0 = arith.constant 0 : i32
    return %arg0, %c0_i32 : i32, i32
  }
  func.func @transform_1(%arg0: i32) -> (i32, i32, i32) {
    %c0_i32 = arith.constant 0 : i32
    %c0_i32_0 = arith.constant 0 : i32
    %c0_i32_1 = arith.constant 0 : i32
    return %arg0, %c0_i32, %c0_i32_0 : i32, i32, i32
  }
}

module attributes {stable_mosaic.version = 11 : i64} {
  func.func @_quantize_kernel(%arg0: i32, %arg1: memref<2xf32, #tpu.memory_space<smem>>, %arg2: memref<8x256xf32, #tpu.memory_space<vmem>>, %arg3: memref<8x256xi8, #tpu.memory_space<vmem>>) attributes {dimension_semantics = [#tpu.dimension_semantics<parallel>], iteration_bounds = array<i64: 1>, scalar_prefetch = 0 : i64, scratch_operands = 0 : i64, tpu.core_type = #tpu.core_type<tc>, window_params = [{transform_indices = @transform_0, window_bounds = array<i64: 2>}, {transform_indices = @transform_1, window_bounds = array<i64: 8, 256>}, {transform_indices = @transform_2, window_bounds = array<i64: 8, 256>}]} {
    %c0 = arith.constant 0 : index
    %0 = memref.load %arg1[%c0] : memref<2xf32, #tpu.memory_space<smem>>
    %c1 = arith.constant 1 : index
    %1 = memref.load %arg1[%c1] : memref<2xf32, #tpu.memory_space<smem>>
    %c0_0 = arith.constant 0 : index
    %c0_1 = arith.constant 0 : index
    %2 = vector.load %arg2[%c0_0, %c0_1] : memref<8x256xf32, #tpu.memory_space<vmem>>, vector<8x256xf32>
    %3 = vector.broadcast %0 : f32 to vector<8x256xf32>
    %4 = arith.mulf %2, %3 : vector<8x256xf32>
    %5 = math.roundeven %4 : vector<8x256xf32>
    %6 = vector.broadcast %1 : f32 to vector<8x256xf32>
    %7 = arith.addf %5, %6 : vector<8x256xf32>
    %cst = arith.constant 0.000000e+00 : f32
    %cst_2 = arith.constant 2.550000e+02 : f32
    %8 = vector.broadcast %cst : f32 to vector<8x256xf32>
    %9 = arith.maximumf %8, %7 : vector<8x256xf32>
    %10 = vector.broadcast %cst_2 : f32 to vector<8x256xf32>
    %11 = arith.minimumf %10, %9 : vector<8x256xf32>
    %12 = arith.fptoui %11 : vector<8x256xf32> to vector<8x256xi8>
    %c0_3 = arith.constant 0 : index
    %c0_4 = arith.constant 0 : index
    %13 = vector.load %arg3[%c0_3, %c0_4] : memref<8x256xi8, #tpu.memory_space<vmem>>, vector<8x256xi8>
    tpu.vector_store %arg3[%c0_3, %c0_4], %12 {strides = array<i32>} : memref<8x256xi8, #tpu.memory_space<vmem>>, vector<8x256xi8>,
    return
  }
  func.func @transform_0(%arg0: i32) -> i32 {
    %c0_i32 = arith.constant 0 : i32
    %c0_i32_0 = arith.constant 0 : i32
    return %c0_i32 : i32
  }
  func.func @transform_1(%arg0: i32) -> (i32, i32) {
    %c0_i32 = arith.constant 0 : i32
    %c0_i32_0 = arith.constant 0 : i32
    return %arg0, %c0_i32 : i32, i32
  }
  func.func @transform_2(%arg0: i32) -> (i32, i32) {
    %c0_i32 = arith.constant 0 : i32
    %c0_i32_0 = arith.constant 0 : i32
    return %arg0, %c0_i32 : i32, i32
  }
}

</mosaic_0001>

<bundles_post_ra>
// kernel: qinput_forward.2
= control target key start
LH: loop header
LB: loop body
LE: loop exit
PB: predicated region body
PF: predicated region fallthrough
CT: control target
= control target key end

     0   :  { %vm34_vm0 = vcmask 1040384   ;;  %s73_s0 = inlined_call_operand.vmem [shape: f32[8,256], index: 0, kind: input, shape index: {}]   ;;  %s74_s1 = inlined_call_operand.vmem [shape: f32[1,2,256], index: 1, kind: output, shape index: {}]  }
   0x1   :  { %v8_v0 = vld [vmem:[%s73_s0] sm:$0xff]  ;;  %v9_v1 = vld [vmem:[%s73_s0 + $0x8] sm:$0xff] }
   0x2   :  { %v10_v2 = vrot.slane %v8_v0, 4  ;;  %v16_v3 = vrot.slane %v9_v1, 4 }
   0x4   :  { %v11_v4 = vmin.f32 %v8_v0, %v10_v2  ;;  %v17_v5 = vmin.f32 %v9_v1, %v16_v3  ;;  %v23_v6 = vmax.f32 %v8_v0, %v10_v2  ;;  %v29_v7 = vmax.f32 %v9_v1, %v16_v3 }
   0x6   :  { %v12_v8 = vrot.slane %v11_v4, 2  ;;  %v18_v9 = vrot.slane %v17_v5, 2  ;;  %v24_v10 = vrot.slane %v23_v6, 2  ;;  %v30_v11 = vrot.slane %v29_v7, 2 }
   0x8   :  { %v13_v12 = vmin.f32 %v11_v4, %v12_v8  ;;  %v19_v13 = vmin.f32 %v17_v5, %v18_v9  ;;  %v25_v14 = vmax.f32 %v23_v6, %v24_v10  ;;  %v31_v15 = vmax.f32 %v29_v7, %v30_v11 }
   0xa   :  { %v14_v16 = vrot.slane %v13_v12, 1  ;;  %v20_v17 = vrot.slane %v19_v13, 1  ;;  %v26_v18 = vrot.slane %v25_v14, 1  ;;  %v32_v19 = vrot.slane %v31_v15, 1 }
   0xc   :  { %v15_v20 = vmin.f32 %v13_v12, %v14_v16  ;;  %v21_v21 = vmin.f32 %v19_v13, %v20_v17  ;;  %v27_v22 = vmax.f32 %v25_v14, %v26_v18  ;;  %v33_v23 = vmax.f32 %v31_v15, %v32_v19 }
   0xe   :  { %v35_v24 = vsel %vm34_vm0, %v15_v20, %v27_v22  ;;  %v36_v25 = vsel %vm34_vm0, %v21_v21, %v33_v23 }
   0xf   :  { %v39_v26 = vcombine.low %v35_v24, %v36_v25 }
  0x11   :  { %53 = vst.sshfl [vmem:[%s74_s1] sm:$0x33 pattern:$0x76325410] %v39_v26 }

// kernel: qinput_forward.3
= control target key start
LH: loop header
LB: loop body
LE: loop exit
PB: predicated region body
PF: predicated region fallthrough
CT: control target
= control target key end

     0   :  { %7 = vsyncpa [#allocation3], 0  ;;  %s110_s0 = inlined_call_operand.vmem [shape: f32[2], index: 0, kind: input, shape index: {}]   ;;  %s111_s1 = inlined_call_operand.vmem [shape: f32[8,256], index: 1, kind: input, shape index: {}]   ;;  %s112_s2 = inlined_call_operand.vmem [shape: u8[8,256], index: 2, kind: output, shape index: {}]  }
   0x1   :  { %s14_s11 = sshll.u32 %s110_s0, 4  ;;  %s15_s11 = int_to_ptr.vmem [resolvable:$true] %s14_s11 }
   0x2   :  { %s68_s12 = scalar_lea.vmem %s15_s11, 16  ;;  %p73_p1 = scmp.lt.s32.totalorder %s15_s11, %s15_s11 }
   0x3   :  { %p69_p0 = scmp.ne.s32.totalorder %s15_s11, %s68_s12  ;;  %p74_p2 = scmp.lt.s32.totalorder %s68_s12, %s68_s12 }
   0x5   :  { %p75_p3 = por %p74_p2, %p73_p1 }
   0x7   :  { %p76_p4 = pnand %p75_p3, %p69_p0 }
   0x9   :  { %79 = shalt.err (!%p76_p4)
}
   0xa   :  { %s82_s13 = smov [#allocation2]  }
   0xb   :  { %17 = dma.vmem_to_smem %s15_s11, 16, %s82_s13, [#allocation3]  }
   0xc   :  { %80 = dma.done.wait [#allocation3], 16  }
   0xd   :  { %81 = vsyncadd [#allocation3], 4294967280 }
   0xe   :  { %23 = sfence }
   0xf   :  { %s24_s14 = sld [smem:[#allocation2]]  ;;  %s64_s15 = sld [smem:[#allocation2 + $0x1]]  ;;  %v26_v0 = vld [vmem:[%s111_s1] sm:$0xff]  ;;  %v27_v1 = vld [vmem:[%s111_s1 + $0x8] sm:$0xff] }
  0x15   :  { %v28_v2 = vstv %s24_s14  ;;  %v33_v5 = vstv %s64_s15 }
  0x16   :  { %v29_v3 = vmul.f32 %v28_v2, %v26_v0  ;;  %v30_v4 = vmul.f32 %v28_v2, %v27_v1 }
  0x18   :  { %v65_v6 = vround.rtne.f32 %v29_v3  ;;  %v66_v7 = vround.rtne.f32 %v30_v4 }
  0x1a   :  { %v34_v8 = vadd.f32 %v65_v6, %v33_v5  ;;  %v35_v9 = vadd.f32 %v66_v7, %v33_v5 }
  0x1c   :  { %v36_v10 = vmax.f32 %v34_v8, 0.0  ;;  %v37_v11 = vmax.f32 %v35_v9, 0.0 }
  0x1e   :  { %v38_v12 = vmin.f32 %v36_v10, 255.0  ;;  %v39_v13 = vmin.f32 %v37_v11, 255.0 }
  0x20   :  { %v40_v14 = vtrunc.f32 %v38_v12  ;;  %v41_v15 = vtrunc.f32 %v39_v13 }
  0x22   :  { %v42_v16 = vpack.c.f32.eXmY %v40_v14, %v40_v14, 56  ;;  %v48_v17 = vpack.c.f32.eXmY %v41_v15, %v41_v15, 56 }
  0x24   :  { %v46_v18 = vpack.c.b8 %v42_v16, %v42_v16  ;;  %v52_v19 = vpack.c.b8 %v48_v17, %v48_v17 }
  0x26   :  { %v54_v20 = vunpack.c.0.s8 %v46_v18  ;;  %v55_v21 = vunpack.c.0.s8 %v52_v19 }
  0x28   :  { %v56_v22 = vpack.c.b16 %v55_v21, %v54_v20 }
  0x2a   :  { %v57_v23 = vpack.c.b8 %v56_v22, %v56_v22 }
  0x2c   :  { %58 = vst [vmem:[%s112_s2] sm:$0xf] %v57_v23 }
  0x2d   :  { %63 = vsyncpa [#allocation3], 1 }

</bundles_post_ra>
